<compile_context>
chip_gen: v7x
topology: tpu7x:2x2x1
jax: 0.10.0
libtpu: 0.0.40
codegen_flags: <defaults>
</compile_context>

<pallas_src>
import jax
import jax.numpy as jnp
from jax.experimental import pallas as pl
from jax.experimental.pallas import tpu as pltpu

N_CELLS = 4
N_FEATURES = 4
N_STATE = N_CELLS + N_FEATURES      # 8  (get_state: one-hot(n_cells) + 4 scalars)
HIDDEN = 64
N_ACTIONS = 2
N_RELS = 2

WCAT_OUT = 3 * HIDDEN               # 192: [W0 | W1 | Wself] output width
OUT_PAD = 128                       # lane-dense output width


def _dqn_kernel(a_ref, x_ref, w_ref, b_ref, mask_ref, out_ref):
    n = x_ref.shape[0]
    a_cat = a_ref[...]                                           # [N, 2N] bf16

    def rel_conv(h_bf, li, f_out):
        # One fused MXU dot for W0, W1, Wself: [N,64] @ [64,192]
        m = jnp.dot(h_bf, w_ref[li], preferred_element_type=jnp.float32)  # [N,192] f32
        # One fused aggregation dot: [A0|A1] @ [M0;M1]
        m01 = jnp.concatenate([m[:, :f_out], m[:, f_out:2 * f_out]],
                              axis=0).astype(jnp.bfloat16)                # [2N, f_out]
        agg = jnp.dot(a_cat, m01, preferred_element_type=jnp.float32)     # [N, f_out]
        bias = b_ref[li][0, :f_out]                                       # [f_out] f32
        return agg + m[:, 2 * f_out:3 * f_out] + bias                     # + self-loop + bias

    h = jnp.maximum(rel_conv(x_ref[...], 0, HIDDEN), 0.0).astype(jnp.bfloat16)
    h = jnp.maximum(rel_conv(h, 1, HIDDEN), 0.0).astype(jnp.bfloat16)
    q = rel_conv(h, 2, N_ACTIONS)                                # [N, 2] f32

    # action masking: x * ~mask + mask * (x.min() - 1)
    mask = mask_ref[...]                                         # [N, 2], 1.0 = masked
    qmin = jnp.min(q)                                            # min over VALID cols only
    q_masked = q * (1.0 - mask) + mask * (qmin - 1.0)

    # lane-dense store: full 128-wide slab; wrapper slices [:, :2]
    out_ref[...] = jnp.concatenate(
        [q_masked, jnp.zeros((n, OUT_PAD - N_ACTIONS), jnp.float32)], axis=1)


def _pack_weight_slabs(params):
    """Pack weights into one bf16 slab [3, 64, 192] and biases into [3, 1, 192] f32."""
    dims = [(N_STATE, HIDDEN), (HIDDEN, HIDDEN), (HIDDEN, N_ACTIONS)]
    w_slabs, b_slabs = [], []
    for li, (fi, fo) in enumerate(dims, start=1):
        w = jnp.zeros((HIDDEN, WCAT_OUT), jnp.float32)
        w = w.at[:fi, 0:fo].set(params[f"w0_{li}"])
        w = w.at[:fi, fo:2 * fo].set(params[f"w1_{li}"])
        w = w.at[:fi, 2 * fo:3 * fo].set(params[f"ws_{li}"])
        b = jnp.zeros((1, WCAT_OUT), jnp.float32).at[0, :fo].set(params[f"b_{li}"][0])
        w_slabs.append(w)
        b_slabs.append(b)
    return (jnp.stack(w_slabs).astype(jnp.bfloat16),   # [3, 64, 192] bf16
            jnp.stack(b_slabs))                        # [3, 1, 192] f32


def dqn_forward(x, src, dst, etypes, cell_types, max_size, params):
    """Batched forward. x: [B,N,N_STATE] f32, src/dst/etypes: [B,E] i32,
    cell_types: [B,N,2] i32, max_size: [B,N] i32. Returns masked Q [B,N,2]."""
    b_sz, n, _ = x.shape
    w_slab, b_slab = _pack_weight_slabs(params)

    # glue: densify relational graph, build action mask, pad features to 64
    def build(x_g, src_g, dst_g, et_g, ct_g, ms_g):
        adj = jnp.zeros((N_RELS, n, n), jnp.float32).at[et_g, dst_g, src_g].add(1.0)
        a_cat = jnp.concatenate([adj[0], adj[1]], axis=1).astype(jnp.bfloat16)  # [N, 2N]
        upper = ct_g[:, 1] >= (ms_g - 1)
        lower = ct_g[:, 1] == 0
        mask = jnp.stack([upper, lower], axis=1).astype(jnp.float32)            # [N, 2]
        x64 = jnp.pad(x_g, ((0, 0), (0, HIDDEN - N_STATE))).astype(jnp.bfloat16)  # [N, 64]
        return a_cat, x64, mask

    a_cat, x64, mask = jax.vmap(build)(x, src, dst, etypes, cell_types, max_size)

    out = pl.pallas_call(
        _dqn_kernel,
        out_shape=jax.ShapeDtypeStruct((b_sz, n, OUT_PAD), jnp.float32),
        grid=(b_sz,),
        in_specs=[
            pl.BlockSpec((None, n, 2 * n), lambda b: (b, 0, 0)),          # fused adjacency
            pl.BlockSpec((None, n, HIDDEN), lambda b: (b, 0, 0)),         # padded bf16 features
            pl.BlockSpec((3, HIDDEN, WCAT_OUT), lambda b: (0, 0, 0)),     # shared weight slab
            pl.BlockSpec((3, 1, WCAT_OUT), lambda b: (0, 0, 0)),          # shared bias slab
            pl.BlockSpec((None, n, N_ACTIONS), lambda b: (b, 0, 0)),      # action mask
        ],
        out_specs=pl.BlockSpec((None, n, OUT_PAD), lambda b: (b, 0, 0)),
        compiler_params=pltpu.CompilerParams(
            dimension_semantics=("parallel",)),
    )(a_cat, x64, w_slab, b_slab, mask)

    return out[:, :, :N_ACTIONS]


def _init_params(key):
    """Deterministic init matching RelGraphConv(in, out, 2) parameter shapes."""
    dims = [(N_STATE, HIDDEN), (HIDDEN, HIDDEN), (HIDDEN, N_ACTIONS)]
    params = {}
    for li, (fi, fo) in enumerate(dims, start=1):
        key, k0, k1, k2 = jax.random.split(key, 4)
        scale = 1.0 / jnp.sqrt(jnp.float32(fi))
        params[f"w0_{li}"] = jax.random.normal(k0, (fi, fo), jnp.float32) * scale
        params[f"w1_{li}"] = jax.random.normal(k1, (fi, fo), jnp.float32) * scale
        params[f"ws_{li}"] = jax.random.normal(k2, (fi, fo), jnp.float32) * scale
        params[f"b_{li}"] = jnp.zeros((1, fo), jnp.float32)
    return params


def _reference_single(x, src, dst, etypes, cell_types, max_size, params):
    """Pure-JAX f32 reference of the original module semantics (one graph)."""
    n = x.shape[0]
    adj = jnp.zeros((N_RELS, n, n), jnp.float32).at[etypes, dst, src].add(1.0)
    a0, a1 = adj[0], adj[1]

    def conv(h, li):
        return (a0 @ (h @ params[f"w0_{li}"]) + a1 @ (h @ params[f"w1_{li}"])
                + h @ params[f"ws_{li}"] + params[f"b_{li}"])

    h = jnp.maximum(conv(x, 1), 0.0)
    h = jnp.maximum(conv(h, 2), 0.0)
    h = conv(h, 3)
    upper = cell_types[:, 1] >= (max_size - 1)
    lower = cell_types[:, 1] == 0
    mask = jnp.stack([upper, lower], axis=1).astype(jnp.float32)
    return h * (1.0 - mask) + mask * (jnp.min(h) - 1.0)


if __name__ == "__main__":
    key = jax.random.PRNGKey(0)
    k_graph, k_state, k_param = jax.random.split(key, 3)

    # small synthetic circuit graphs, batched (exercises the parallel grid axis)
    B, N, E = 2, 16, 32
    ks, kd, ke, kc, ksz = jax.random.split(k_graph, 5)
    src = jax.random.randint(ks, (B, E), 0, N, jnp.int32)
    dst = jax.random.randint(kd, (B, E), 0, N, jnp.int32)
    etypes = jax.random.randint(ke, (B, E), 0, N_RELS, jnp.int32)
    cell_types = jnp.stack(
        [jax.random.randint(kc, (B, N), 0, N_CELLS, jnp.int32),
         jax.random.randint(ksz, (B, N), 0, 4, jnp.int32)], axis=-1)   # [B, N, 2]
    max_size = jnp.full((B, N), 4, jnp.int32)

    # node state vectors (forward called with x given)
    x = jax.random.normal(k_state, (B, N, N_STATE), jnp.float32)

    params = _init_params(k_param)

    out = dqn_forward(x, src, dst, etypes, cell_types, max_size, params)
    out = jax.block_until_ready(out)

    # sanity-check against a pure-JAX f32 reference (kernel uses bf16 MXU operands)
    ref = jax.vmap(
        lambda xg, sg, dg, eg, cg, mg: _reference_single(xg, sg, dg, eg, cg, mg, params)
    )(x, src, dst, etypes, cell_types, max_size)

    assert out.shape == (B, N, N_ACTIONS)
    assert jnp.allclose(out, ref, atol=1e-1, rtol=5e-2), (
        f"max abs diff {jnp.max(jnp.abs(out - ref))}")

    print("KERNEL_OK")
</pallas_src>

<mosaic_0001>
module attributes {stable_mosaic.version = 11 : i64} {
  func.func @_dqn_kernel(%arg0: i32, %arg1: memref<1x16x32xbf16, #tpu.memory_space<vmem>>, %arg2: memref<1x16x64xbf16, #tpu.memory_space<vmem>>, %arg3: memref<3x64x192xbf16, #tpu.memory_space<vmem>>, %arg4: memref<3x1x192xf32, #tpu.memory_space<vmem>>, %arg5: memref<1x16x2xf32, #tpu.memory_space<vmem>>, %arg6: memref<1x16x128xf32, #tpu.memory_space<vmem>>) attributes {dimension_semantics = [#tpu.dimension_semantics<parallel>], iteration_bounds = array<i64: 2>, scalar_prefetch = 0 : i64, scratch_operands = 0 : i64, tpu.core_type = #tpu.core_type<tc>, window_params = [{transform_indices = @transform_0, window_bounds = array<i64: 1, 16, 32>}, {transform_indices = @transform_1, window_bounds = array<i64: 1, 16, 64>}, {pipeline_mode = #tpu.pipeline_mode<synchronous>, transform_indices = @transform_2, window_bounds = array<i64: 3, 64, 192>}, {pipeline_mode = #tpu.pipeline_mode<synchronous>, transform_indices = @transform_3, window_bounds = array<i64: 3, 1, 192>}, {transform_indices = @transform_4, window_bounds = array<i64: 1, 16, 2>}, {transform_indices = @transform_5, window_bounds = array<i64: 1, 16, 128>}]} {
    %c0 = arith.constant 0 : index
    %c0_0 = arith.constant 0 : index
    %c0_1 = arith.constant 0 : index
    %0 = vector.load %arg1[%c0, %c0_0, %c0_1] : memref<1x16x32xbf16, #tpu.memory_space<vmem>>, vector<1x16x32xbf16>
    %1 = vector.shape_cast %0 : vector<1x16x32xbf16> to vector<16x32xbf16>
    %c0_2 = arith.constant 0 : index
    %c0_3 = arith.constant 0 : index
    %c0_4 = arith.constant 0 : index
    %2 = vector.load %arg2[%c0_2, %c0_3, %c0_4] : memref<1x16x64xbf16, #tpu.memory_space<vmem>>, vector<1x16x64xbf16>
    %3 = vector.shape_cast %2 : vector<1x16x64xbf16> to vector<16x64xbf16>
    %c0_5 = arith.constant 0 : index
    %c0_6 = arith.constant 0 : index
    %c0_7 = arith.constant 0 : index
    %4 = vector.load %arg3[%c0_5, %c0_6, %c0_7] : memref<3x64x192xbf16, #tpu.memory_space<vmem>>, vector<1x64x192xbf16>
    %5 = vector.shape_cast %4 : vector<1x64x192xbf16> to vector<64x192xbf16>
    %cst = arith.constant dense<0.000000e+00> : vector<16x192xf32>
    %6 = tpu.matmul %3, %5, %cst {dimension_numbers = #tpu.dot_dimension_numbers<[1], [0], [0], [1], [0, 0, 1, 1], [], []>} : vector<16x64xbf16>, vector<64x192xbf16>, vector<16x192xf32> -> vector<16x192xf32>
    %7 = vector.extract_strided_slice %6 {offsets = [0, 0], sizes = [16, 64], strides = [1, 1]} : vector<16x192xf32> to vector<16x64xf32>
    %8 = vector.extract_strided_slice %6 {offsets = [0, 64], sizes = [16, 64], strides = [1, 1]} : vector<16x192xf32> to vector<16x64xf32>
    %9 = tpu.concatenate %7, %8 in 0 : vector<16x64xf32>, vector<16x64xf32> -> vector<32x64xf32>
    %10 = arith.truncf %9 : vector<32x64xf32> to vector<32x64xbf16>
    %cst_8 = arith.constant dense<0.000000e+00> : vector<16x64xf32>
    %11 = tpu.matmul %1, %10, %cst_8 {dimension_numbers = #tpu.dot_dimension_numbers<[1], [0], [0], [1], [0, 0, 1, 1], [], []>} : vector<16x32xbf16>, vector<32x64xbf16>, vector<16x64xf32> -> vector<16x64xf32>
    %c0_9 = arith.constant 0 : index
    %c0_10 = arith.constant 0 : index
    %c0_11 = arith.constant 0 : index
    %12 = vector.load %arg4[%c0_9, %c0_10, %c0_11] : memref<3x1x192xf32, #tpu.memory_space<vmem>>, vector<1x1x192xf32>
    %13 = vector.shape_cast %12 : vector<1x1x192xf32> to vector<1x192xf32>
    %14 = vector.extract_strided_slice %13 {offsets = [0, 0], sizes = [1, 64], strides = [1, 1]} : vector<1x192xf32> to vector<1x64xf32>
    %15 = vector.shape_cast %14 : vector<1x64xf32> to vector<64xf32>
    %16 = vector.extract_strided_slice %6 {offsets = [0, 128], sizes = [16, 64], strides = [1, 1]} : vector<16x192xf32> to vector<16x64xf32>
    %17 = arith.addf %11, %16 : vector<16x64xf32>
    %18 = vector.shape_cast %15 : vector<64xf32> to vector<1x64xf32>
    %19 = vector.broadcast %18 : vector<1x64xf32> to vector<16x64xf32>
    %20 = arith.addf %17, %19 : vector<16x64xf32>
    %cst_12 = arith.constant 0.000000e+00 : f32
    %21 = vector.broadcast %cst_12 : f32 to vector<16x64xf32>
    %22 = arith.maximumf %20, %21 : vector<16x64xf32>
    %23 = arith.truncf %22 : vector<16x64xf32> to vector<16x64xbf16>
    %c1 = arith.constant 1 : index
    %c0_13 = arith.constant 0 : index
    %c0_14 = arith.constant 0 : index
    %24 = vector.load %arg3[%c1, %c0_13, %c0_14] : memref<3x64x192xbf16, #tpu.memory_space<vmem>>, vector<1x64x192xbf16>
    %25 = vector.shape_cast %24 : vector<1x64x192xbf16> to vector<64x192xbf16>
    %cst_15 = arith.constant dense<0.000000e+00> : vector<16x192xf32>
    %26 = tpu.matmul %23, %25, %cst_15 {dimension_numbers = #tpu.dot_dimension_numbers<[1], [0], [0], [1], [0, 0, 1, 1], [], []>} : vector<16x64xbf16>, vector<64x192xbf16>, vector<16x192xf32> -> vector<16x192xf32>
    %27 = vector.extract_strided_slice %26 {offsets = [0, 0], sizes = [16, 64], strides = [1, 1]} : vector<16x192xf32> to vector<16x64xf32>
    %28 = vector.extract_strided_slice %26 {offsets = [0, 64], sizes = [16, 64], strides = [1, 1]} : vector<16x192xf32> to vector<16x64xf32>
    %29 = tpu.concatenate %27, %28 in 0 : vector<16x64xf32>, vector<16x64xf32> -> vector<32x64xf32>
    %30 = arith.truncf %29 : vector<32x64xf32> to vector<32x64xbf16>
    %cst_16 = arith.constant dense<0.000000e+00> : vector<16x64xf32>
    %31 = tpu.matmul %1, %30, %cst_16 {dimension_numbers = #tpu.dot_dimension_numbers<[1], [0], [0], [1], [0, 0, 1, 1], [], []>} : vector<16x32xbf16>, vector<32x64xbf16>, vector<16x64xf32> -> vector<16x64xf32>
    %c1_17 = arith.constant 1 : index
    %c0_18 = arith.constant 0 : index
    %c0_19 = arith.constant 0 : index
    %32 = vector.load %arg4[%c1_17, %c0_18, %c0_19] : memref<3x1x192xf32, #tpu.memory_space<vmem>>, vector<1x1x192xf32>
    %33 = vector.shape_cast %32 : vector<1x1x192xf32> to vector<1x192xf32>
    %34 = vector.extract_strided_slice %33 {offsets = [0, 0], sizes = [1, 64], strides = [1, 1]} : vector<1x192xf32> to vector<1x64xf32>
    %35 = vector.shape_cast %34 : vector<1x64xf32> to vector<64xf32>
    %36 = vector.extract_strided_slice %26 {offsets = [0, 128], sizes = [16, 64], strides = [1, 1]} : vector<16x192xf32> to vector<16x64xf32>
    %37 = arith.addf %31, %36 : vector<16x64xf32>
    %38 = vector.shape_cast %35 : vector<64xf32> to vector<1x64xf32>
    %39 = vector.broadcast %38 : vector<1x64xf32> to vector<16x64xf32>
    %40 = arith.addf %37, %39 : vector<16x64xf32>
    %cst_20 = arith.constant 0.000000e+00 : f32
    %41 = vector.broadcast %cst_20 : f32 to vector<16x64xf32>
    %42 = arith.maximumf %40, %41 : vector<16x64xf32>
    %43 = arith.truncf %42 : vector<16x64xf32> to vector<16x64xbf16>
    %c2 = arith.constant 2 : index
    %c0_21 = arith.constant 0 : index
    %c0_22 = arith.constant 0 : index
    %44 = vector.load %arg3[%c2, %c0_21, %c0_22] : memref<3x64x192xbf16, #tpu.memory_space<vmem>>, vector<1x64x192xbf16>
    %45 = vector.shape_cast %44 : vector<1x64x192xbf16> to vector<64x192xbf16>
    %cst_23 = arith.constant dense<0.000000e+00> : vector<16x192xf32>
    %46 = tpu.matmul %43, %45, %cst_23 {dimension_numbers = #tpu.dot_dimension_numbers<[1], [0], [0], [1], [0, 0, 1, 1], [], []>} : vector<16x64xbf16>, vector<64x192xbf16>, vector<16x192xf32> -> vector<16x192xf32>
    %47 = vector.extract_strided_slice %46 {offsets = [0, 0], sizes = [16, 2], strides = [1, 1]} : vector<16x192xf32> to vector<16x2xf32>
    %48 = vector.extract_strided_slice %46 {offsets = [0, 2], sizes = [16, 2], strides = [1, 1]} : vector<16x192xf32> to vector<16x2xf32>
    %49 = tpu.concatenate %47, %48 in 0 : vector<16x2xf32>, vector<16x2xf32> -> vector<32x2xf32>
    %50 = arith.truncf %49 : vector<32x2xf32> to vector<32x2xbf16>
    %cst_24 = arith.constant dense<0.000000e+00> : vector<16x2xf32>
    %51 = tpu.matmul %1, %50, %cst_24 {dimension_numbers = #tpu.dot_dimension_numbers<[1], [0], [0], [1], [0, 0, 1, 1], [], []>} : vector<16x32xbf16>, vector<32x2xbf16>, vector<16x2xf32> -> vector<16x2xf32>
    %c2_25 = arith.constant 2 : index
    %c0_26 = arith.constant 0 : index
    %c0_27 = arith.constant 0 : index
    %52 = vector.load %arg4[%c2_25, %c0_26, %c0_27] : memref<3x1x192xf32, #tpu.memory_space<vmem>>, vector<1x1x192xf32>
    %53 = vector.shape_cast %52 : vector<1x1x192xf32> to vector<1x192xf32>
    %54 = vector.extract_strided_slice %53 {offsets = [0, 0], sizes = [1, 2], strides = [1, 1]} : vector<1x192xf32> to vector<1x2xf32>
    %55 = vector.shape_cast %54 : vector<1x2xf32> to vector<2xf32>
    %56 = vector.extract_strided_slice %46 {offsets = [0, 4], sizes = [16, 2], strides = [1, 1]} : vector<16x192xf32> to vector<16x2xf32>
    %57 = arith.addf %51, %56 : vector<16x2xf32>
    %58 = vector.shape_cast %55 : vector<2xf32> to vector<1x2xf32>
    %59 = vector.broadcast %58 : vector<1x2xf32> to vector<16x2xf32>
    %60 = arith.addf %57, %59 : vector<16x2xf32>
    %c0_28 = arith.constant 0 : index
    %c0_29 = arith.constant 0 : index
    %c0_30 = arith.constant 0 : index
    %61 = vector.load %arg5[%c0_28, %c0_29, %c0_30] : memref<1x16x2xf32, #tpu.memory_space<vmem>>, vector<1x16x2xf32>
    %62 = vector.shape_cast %61 : vector<1x16x2xf32> to vector<16x2xf32>
    %63 = vector.shape_cast %60 : vector<16x2xf32> to vector<1x16x2xf32>
    %cst_31 = arith.constant dense<0x7F800000> : vector<1xf32>
    %64 = vector.multi_reduction <minimumf>, %63, %cst_31 [1, 2] : vector<1x16x2xf32> to vector<1xf32>
    %65 = vector.shape_cast %64 : vector<1xf32> to vector<1x1x1xf32>
    %66 = vector.extract %65[0, 0, 0] : f32 from vector<1x1x1xf32>
    %cst_32 = arith.constant 1.000000e+00 : f32
    %67 = vector.broadcast %cst_32 : f32 to vector<16x2xf32>
    %68 = arith.subf %67, %62 : vector<16x2xf32>
    %69 = arith.mulf %60, %68 : vector<16x2xf32>
    %cst_33 = arith.constant 1.000000e+00 : f32
    %70 = arith.subf %66, %cst_33 : f32
    %71 = vector.broadcast %70 : f32 to vector<16x2xf32>
    %72 = arith.mulf %62, %71 : vector<16x2xf32>
    %73 = arith.addf %69, %72 : vector<16x2xf32>
    %cst_34 = arith.constant 0.000000e+00 : f32
    %74 = vector.broadcast %cst_34 : f32 to vector<16x126xf32>
    %75 = tpu.concatenate %73, %74 in 1 : vector<16x2xf32>, vector<16x126xf32> -> vector<16x128xf32>
    %c0_35 = arith.constant 0 : index
    %c0_36 = arith.constant 0 : index
    %c0_37 = arith.constant 0 : index
    %76 = vector.load %arg6[%c0_35, %c0_36, %c0_37] : memref<1x16x128xf32, #tpu.memory_space<vmem>>, vector<1x16x128xf32>
    %77 = vector.shape_cast %76 : vector<1x16x128xf32> to vector<16x128xf32>
    %78 = vector.shape_cast %75 : vector<16x128xf32> to vector<1x16x128xf32>
    tpu.vector_store %arg6[%c0_35, %c0_36, %c0_37], %78 {strides = array<i32>} : memref<1x16x128xf32, #tpu.memory_space<vmem>>, vector<1x16x128xf32>,
    return
  }
  func.func @transform_0(%arg0: i32) -> (i32, i32, i32) {
    %c0_i32 = arith.constant 0 : i32
    %c0_i32_0 = arith.constant 0 : i32
    %c0_i32_1 = arith.constant 0 : i32
    return %arg0, %c0_i32, %c0_i32_0 : i32, i32, i32
  }
  func.func @transform_1(%arg0: i32) -> (i32, i32, i32) {
    %c0_i32 = arith.constant 0 : i32
    %c0_i32_0 = arith.constant 0 : i32
    %c0_i32_1 = arith.constant 0 : i32
    return %arg0, %c0_i32, %c0_i32_0 : i32, i32, i32
  }
  func.func @transform_2(%arg0: i32) -> (i32, i32, i32) {
    %c0_i32 = arith.constant 0 : i32
    %c0_i32_0 = arith.constant 0 : i32
    %c0_i32_1 = arith.constant 0 : i32
    %c0_i32_2 = arith.constant 0 : i32
    return %c0_i32, %c0_i32_0, %c0_i32_1 : i32, i32, i32
  }
  func.func @transform_3(%arg0: i32) -> (i32, i32, i32) {
    %c0_i32 = arith.constant 0 : i32
    %c0_i32_0 = arith.constant 0 : i32
    %c0_i32_1 = arith.constant 0 : i32
    %c0_i32_2 = arith.constant 0 : i32
    return %c0_i32, %c0_i32_0, %c0_i32_1 : i32, i32, i32
  }
  func.func @transform_4(%arg0: i32) -> (i32, i32, i32) {
    %c0_i32 = arith.constant 0 : i32
    %c0_i32_0 = arith.constant 0 : i32
    %c0_i32_1 = arith.constant 0 : i32
    return %arg0, %c0_i32, %c0_i32_0 : i32, i32, i32
  }
  func.func @transform_5(%arg0: i32) -> (i32, i32, i32) {
    %c0_i32 = arith.constant 0 : i32
    %c0_i32_0 = arith.constant 0 : i32
    %c0_i32_1 = arith.constant 0 : i32
    return %arg0, %c0_i32, %c0_i32_0 : i32, i32, i32
  }
}

</mosaic_0001>

<bundles_post_ra>
// kernel: tpu_custom_call.1
= control target key start
LH: loop header
LB: loop body
LE: loop exit
PB: predicated region body
PF: predicated region fallthrough
CT: control target
= control target key end

     0   :  { %10 = vsyncpa [#allocation3], 0  ;;  %s1452_s0 = inlined_call_operand.vmem [shape: bf16[2,16,32], index: 0, kind: input, shape index: {}]   ;;  %s1453_s1 = inlined_call_operand.vmem [shape: bf16[2,16,64], index: 1, kind: input, shape index: {}]   ;;  %s1454_s2 = inlined_call_operand.hbm [shape: bf16[3,64,192], index: 2, kind: input, shape index: {}]   ;;  %s1455_s3 = inlined_call_operand.vmem [shape: f32[3,1,192], index: 3, kind: input, shape index: {}]   ;;  %s1456_s4 = inlined_call_operand.vmem [shape: f32[2,16,2], index: 4, kind: input, shape index: {}]   ;;  %s1457_s5 = inlined_call_operand.hbm [shape: f32[2,16,128], index: 5, kind: output, shape index: {}]  }
   0x1   :  { %11 = vsyncpa [#allocation4], 0 }
   0x2   :  { %13 = vsyncpa [#allocation4 + $0x1], 0  ;;  %s1258_s18 = smov 0   ;;  %s1260_s19 = smov 0  }
   0x3   :  { %s1262_s20 = smov 0   ;;  %s1264_s21 = smov 0  }
   0x4 LB: > { %s1279_s22 = sadd.s32 4294967295, %s1214_s21   ;;  %s915_s23 = sadd.s32 4294967294, %s1214_s21   ;;  %s1214_s21 = sphi %s1264_s21, %s1473_s21   ;;  %s1210_s20 = sphi %s1262_s20, %s1472_s20   ;;  %s1206_s19 = sphi %s1260_s19, %s1471_s19   ;;  %s1202_s18 = sphi %s1258_s18, %s1470_s18  }
   0x5   : > { %s1283_s24 = sadd.s32 1, %s1214_s21   ;;  %s146_s25 = sadd.s32 1, %s1210_s20 }
   0x6   : > { %s143_s26 = ssub.s32 %s1214_s21, %s1283_s24  ;;  %p156_p0 = scmp.ne.s32.totalorder %s1210_s20, %s1206_s19 }
   0x7   : > { %p144_p1 = scmp.eq.s32.totalorder %s143_s26, 0  ;;  %p157_p2 = scmp.eq.s32.totalorder %s1279_s22, 1 }
   0x8   : > { %p162_p3 = scmp.ne.s32.totalorder %s1206_s19, %s1202_s18  ;;  %p163_p4 = scmp.eq.s32.totalorder %s915_s23, 1 }
   0x9   : > { %s1294_s27 = scalar_select %p144_p1, %s1210_s20, %s146_s25  }
   0xa   : > { %p1296_p5 = por %p157_p2, %p156_p0  ;;  %p1300_p6 = por %p163_p4, %p162_p3 }
   0xb   : > { %p916_p7 = scmp.ge.s32.totalorder %s1214_s21, 1  ;;  %p170_p8 = scmp.lt.s32.totalorder %s1214_s21, 3 }
   0xc   : > { %s1461_s28 = scalar_select %p1296_p5, 1, 0 }
   0xd   : > { %s1462_s29 = scalar_select %p1300_p6, 1, 0 }
   0xe   : > { %p1458_p9 = scmp.eq.s32.totalorder %s1279_s22, 0  ;;  %p1307_p10 = pnand %p916_p7, %p170_p8 }
   0xf   : > { %s1216_s6 = smov [#allocation2]   ;;  %s1120_s11 = scalar_lea.hbm %s1454_s2, 3072 }
  0x10   : > { %s1463_s30 = scalar_select %p1307_p10, 1, 0 }
  0x11   : > { %s182_s7 = sshll.u32 %s1216_s6, 4  ;;  %p1013_p11 = pneg %p1307_p10  ;;  %s183_s7 = int_to_ptr.vmem [resolvable:$true] %s182_s7 }
  0x12   : > { %p1121_p13 = scmp.ne.s32.totalorder %s1454_s2, %s1120_s11  ;;  %p1127_p3 = scmp.lt.u32.totalorder %s1120_s11, %s1454_s2 }
  0x13   : > { %p1315_p12 = pnand %p1458_p9, %p1013_p11 }
  0x15   : > { %p1122_p0 = pneg %p1315_p12 }
  0x17   : > { %p1123_p1 = pnand %p1122_p0, %p1121_p13 }
  0x19   : > { %p1124_p2 = pneg %p1123_p1 }
  0x1b   : > { %p1129_p4 = pnand %p1127_p3, %p1124_p2 }
  0x1d   : > { %1132 = shalt.err (!%p1129_p4)
}
  0x1e   : > { %s1133_s16 = scalar_lea.vmem %s183_s7, 3072  ;;  %p1141_p9 = scmp.lt.s32.totalorder %s183_s7, %s183_s7 }
  0x1f   : > { %p1134_p7 = scmp.ne.s32.totalorder %s183_s7, %s1133_s16  ;;  %p1142_p6 = scmp.lt.s32.totalorder %s1133_s16, %s1133_s16 }
  0x21   : > { %p1136_p8 = pnand %p1134_p7, %p1122_p0  ;;  %p1143_p5 = por %p1142_p6, %p1141_p9 }
  0x23   : > { %p1137_p11 = pneg %p1136_p8 }
  0x25   : > { %p1144_p10 = pnand %p1143_p5, %p1137_p11 }
  0x27   : > { %1147 = shalt.err (!%p1144_p10)
}
  0x28   : > { %s1217_s17 = smov 128   ;;  %s1218_s23 = smov 8  }
  0x29   : > { %1016 = dma.hbm_to_vmem [thread:$0]  (!%p1315_p12), %s1454_s2, 3072, %s183_s7, [#allocation3], %s1217_s17, %s1217_s17, %s1218_s23  }
  0x2a   : > { %p1465_p13 = scmp.ne.s32.totalorder %s1463_s30, 0 }
  0x2b   : > { %p1466_p1 = scmp.eq.s32.totalorder (!%p1465_p13), %s1279_s22, 0 }
  0x2c   : > { %225 = sbr.rel (%p1465_p13) target bundleno = 1975 (0x7b7), region = 40 }
  0x33   : > { %1193 = dma.done.wait (%p1466_p1), [#allocation3], 3072   ;;  %p1467_p0 = pmov %p1466_p1 }
  0x34   : > { %p263_p5 = scmp.lt.s32.totalorder %s1279_s22, 1  ;;  %v1219_v0 = vmov 0   ;;  %v1082_v1 = vld [vmem:[#allocation2 + $0x4] ss:$8 sps:$4 sm:$0xff]   ;;  %v1084_v2 = vld [vmem:[#allocation2] ss:$8 sps:$4 sm:$0xff]   ;;  %v445_v30 = vlaneseq }
  0x35   : > { %1195 = vsyncadd (%p1467_p0), [#allocation3], 4294964224  ;;  %372 = vmatprep.mubr.bf16.mxu0 %v1219_v0  ;;  %340 = vmatprep.subr.bf16.mxu0 %v1082_v1  ;;  %v1085_v3 = vld [vmem:[#allocation2 + $0x14] ss:$8 sps:$4 sm:$0xff]   ;;  %v1087_v4 = vld [vmem:[#allocation2 + $0x10] ss:$8 sps:$4 sm:$0xff]  }
  0x36   : > { %s1344_s6 = scalar_select %p263_p5, %s1279_s22, 1  ;;  %341 = vmatpush1.bf16.msra.mxu0 %v1084_v2  ;;  %v1088_v5 = vld [vmem:[#allocation2 + $0x24] ss:$8 sps:$4 sm:$0xff]   ;;  %v1090_v6 = vld [vmem:[#allocation2 + $0x20] ss:$8 sps:$4 sm:$0xff]   ;;  %vm336_vm0 = vcmask 523264  }
  0x37   : > { %342 = vmatprep.subr.bf16.mxu0 %v1085_v3  ;;  %v1091_v7 = vld [vmem:[#allocation2 + $0x34] ss:$8 sps:$4 sm:$0xff]   ;;  %v1093_v8 = vld [vmem:[#allocation2 + $0x30] ss:$8 sps:$4 sm:$0xff]   ;;  %v1220_v10 = vmov 0.0   ;;  %vm1221_vm1 = vmmov 0  }
  0x38   : > { %s968_s7 = sshll.u32 %s1344_s6, 3  ;;  %981 = vmatprep.subr.bf16.mxu1 %v1220_v10  ;;  %985 = vmatprep.mubr.msk.bf16.mxu1 %vm1221_vm1, %v1220_v10  ;;  %s1222_s13 = smov 64   ;;  %v1098_v20 = vld [vmem:[#allocation2 + $0x44] ss:$8 sps:$4 sm:$0xff]   ;;  %vm399_vm2 = vcmask 261120   ;;  %v446_v31 = vshrl.u32 %v445_v30, 7 }
  0x39   : > { %s272_s9 = scalar_lea.vmem %s1453_s1, %s968_s7  ;;  %s267_s12 = scalar_lea.vmem %s1452_s0, %s968_s7  ;;  %v1096_v23 = vld [vmem:[#allocation2 + $0x40] ss:$8 sps:$4 sm:$0xff]   ;;  %v1101_v24 = vld [vmem:[#allocation2 + $0x54] ss:$8 sps:$4 sm:$0xff]   ;;  %v1099_v25 = vld [vmem:[#allocation2 + $0x50] ss:$8 sps:$4 sm:$0xff]  }
  0x3a   : > { %343 = vmatpush1.bf16.msra.mxu0 %v1087_v4  ;;  %v1094_v9 = vld [vmem:[%s272_s9] sm:$0xff]   ;;  %v1107_v28 = vld [vmem:[#allocation2 + $0x74] ss:$8 sps:$4 sm:$0xff]   ;;  %v1105_v29 = vld [vmem:[#allocation2 + $0x70] ss:$8 sps:$4 sm:$0xff]   ;;  %v1368_v32 = vsub.s32 0, %v446_v31 }
  0x3b   : > { %344 = vmatprep.subr.bf16.mxu0 %v1088_v5  ;;  %v1362_v22 = vld [vmem:[%s267_s12] sm:$0xff]   ;;  %v1113_v58 = vld [vmem:[#allocation2 + $0x94] ss:$8 sps:$4 sm:$0xff]   ;;  %v1111_v59 = vld [vmem:[#allocation2 + $0x90] ss:$8 sps:$4 sm:$0xff]   ;;  %s1223_s23 = smov 124  }
  0x3c   : > { %v1104_v26 = vld [vmem:[#allocation2 + $0x64] ss:$8 sps:$4 sm:$0xff]   ;;  %v1102_v27 = vld [vmem:[#allocation2 + $0x60] ss:$8 sps:$4 sm:$0xff]   ;;  %v1119_v62 = vld [vmem:[#allocation2 + $0xb4] ss:$8 sps:$4 sm:$0xff]  }
  0x3d   : > { %v393_v33 = vld [vmem:[%s1455_s3] sm:$0x3]  ;;  %v1110_v55 = vld [vmem:[#allocation2 + $0x84] ss:$8 sps:$4 sm:$0xff]   ;;  %v1117_v63 = vld [vmem:[#allocation2 + $0xb0] ss:$8 sps:$4 sm:$0xff]  }
  0x3e   : > { %345 = vmatpush1.bf16.msra.mxu0 %v1090_v6  ;;  %v448_v34 = vrot.slane %v393_v33, %v1368_v32  ;;  %v1108_v57 = vld [vmem:[#allocation2 + $0x80] ss:$8 sps:$4 sm:$0xff]   ;;  %v1116_v60 = vld [vmem:[#allocation2 + $0xa4] ss:$8 sps:$4 sm:$0xff]   ;;  %s1224_s25 = smov 126   ;;  %vm776_vm3 = vcmask 15360  }
  0x3f   : > { %346 = vmatprep.subr.bf16.mxu0 %v1091_v7  ;;  %v1114_v61 = vld [vmem:[#allocation2 + $0xa0] ss:$8 sps:$4 sm:$0xff]   ;;  %s970_s30 = sshll.u32 %s1344_s6, 4  ;;  %s260_s8 = sand.u32 1, %s1206_s19  }
  0x40   : > { %v949_v1 = vld [vmem:[%s1455_s3 + $0x2] sm:$0x3]  ;;  %s277_s11 = scalar_lea.vmem %s1456_s4, %s970_s30  ;;  %s921_s12 = sshll.u32 %s260_s8, 4 }
  0x41   : > { %v607_v2 = vrot.slane %v949_v1, %v1368_v32  ;;  %s262_s15 = scalar_lea.vmem [#allocation5], %s921_s12  ;;  %s971_s17 = sshll.u32 %s1279_s22, 8 }
  0x42   : > { %347 = vmatpush1.bf16.msra.mxu0 %v1093_v8  ;;  %s817_s16 = sshll.u32 %s262_s15, 4  ;;  %s1411_s22 = scalar_lea.sflag [#allocation4], %s260_s8  ;;  %s1402_s16 = int_to_ptr.vmem [resolvable:$true] %s817_s16 }
  0x43   : > { %989 = vmatprep.subr.bf16.mxu0 %v1220_v10  ;;  %s1148_s26 = scalar_lea.vmem %s1402_s16, 256  ;;  %p1468_p9 = scmp.ne.s32.totalorder %s1461_s28, 0 }
  0x44   : > { %p1149_p6 = scmp.ne.s32.totalorder %s1402_s16, %s1148_s26  ;;  %s1225_s7 = smov [#allocation5]  }
  0x45   : > { %937 = vmatmul.mubr.msk.bf16.vlgmr.msra.gmra.mrb[0].mxu0 %vm336_vm0, %v1094_v9  ;;  %s1152_s30 = sshll.u32 %s1225_s7, 4  ;;  %s1153_s30 = int_to_ptr.vmem [resolvable:$false] %s1152_s30 }
  0x46   : > { %993 = vmatprep.mubr.msk.bf16.mxu0 %vm1221_vm1, %v1220_v10  ;;  %p1150_p10 = pnand %p1149_p6, %p1468_p9  ;;  %s1154_s9 = scalar_lea.vmem %s1153_s30, 512 }
  0x47   : > { %p1155_p2 = scmp.lt.s32.totalorder %s1402_s16, %s1153_s30  ;;  %p1156_p3 = scmp.lt.s32.totalorder %s1154_s9, %s1148_s26 }
  0x48   : > { %p1151_p12 = pneg %p1150_p10 }
  0x49   : > { %p1157_p4 = por %p1156_p3, %p1155_p2 }
  0x4b   : > { %p1158_p7 = pnand %p1157_p4, %p1151_p12 }
 0x118   : > { %v374_v11 = vpop.f32.mrb[0].mxu0 }
 0x119   : > { %v376_v12 = vpop.f32.mrb[1].mxu0 }
 0x11a   : > { %v378_v13 = vpop.f32.mrb[2].mxu0 }
 0x11b   : > { %v380_v14 = vpop.f32.mrb[3].mxu0  ;;  %v1067_v15 = vpack.i.bf16 %v378_v13, %v374_v11  ;;  %v391_v16 = vpack.c.bf16 %v378_v13, %v374_v11 }
 0x11d   : > { %1068 = vrot.lane.b32.xlu0 %v1067_v15, %s1222_s13  ;;  %982 = vmatpush3.bf16.msra.mxu1 %v391_v16 }
 0x11e   : > { %983 = vmatprep.subr.bf16.mxu1 %v1220_v10 }
 0x18f   : > { %v1069_v17 = vpop.permute.xlu0 %1068 }
 0x190   : > { %v1071_v18 = vunpack.i.h.bf16 %v1069_v17  ;;  %v1070_v19 = vunpack.i.l.bf16 %v1069_v17 }
 0x192   : > { %v392_v21 = vpack.c.bf16 %v1071_v18, %v1070_v19 }
 0x194   : > { %984 = vmatpush3.bf16.msra.mxu1 %v392_v21 }
 0x195   : > { %507 = vmatprep.subr.bf16.mxu1 %v1098_v20 }
 0x197   : > { %986 = vmatmul.mubr.msk.bf16.vlgmr.msra.gmra.mrb[0].mxu1 %vm399_vm2, %v1362_v22 }
 0x198   : > { %508 = vmatpush1.bf16.msra.mxu1 %v1096_v23  ;;  %539 = vmatprep.mubr.bf16.mxu1 %v1219_v0 }
 0x199   : > { %509 = vmatprep.subr.bf16.mxu1 %v1101_v24 }
 0x19c   : > { %510 = vmatpush1.bf16.msra.mxu1 %v1099_v25  ;;  %v960_v25 = vld [vmem:[%s1455_s3 + $0x4] sm:$0x3] }
 0x19d   : > { %511 = vmatprep.subr.bf16.mxu1 %v1104_v26  ;;  %v770_v26 = vrot.slane %v960_v25, %v1368_v32 }
 0x1a0   : > { %512 = vmatpush1.bf16.msra.mxu1 %v1102_v27 }
 0x1a1   : > { %513 = vmatprep.subr.bf16.mxu1 %v1107_v28 }
 0x1a4   : > { %514 = vmatpush1.bf16.msra.mxu1 %v1105_v29 }
 0x1a5   : > { %997 = vmatprep.subr.bf16.mxu1 %v1220_v10 }
 0x26a   : > { %v437_v35 = vpop.f32.mrb[0].mxu1 }
 0x26b   : > { %v438_v36 = vadd.f32 %v437_v35, %v376_v12  ;;  %v987_v37 = vpop.f32.mrb[1].mxu1 }
 0x26c   : > { %v440_v38 = vpop.f32.mrb[2].mxu1 }
 0x26d   : > { %v450_v39 = vadd.f32 %v448_v34, %v438_v36  ;;  %v441_v40 = vadd.f32 %v440_v38, %v380_v14  ;;  %v988_v41 = vpop.f32.mrb[3].mxu1 }
 0x26f   : > { %v451_v42 = vadd.f32 %v448_v34, %v441_v40  ;;  %v452_v43 = vmax.f32 %v450_v39, 0.0 }
 0x271   : > { %v453_v44 = vmax.f32 %v451_v42, 0.0 }
 0x273   : > { %v454_v45 = vpack.c.bf16 %v453_v44, %v452_v43 }
 0x275   : > { %948 = vmatmul.mubr.msk.bf16.vlgmr.msra.gmra.mrb[4].mxu1 %vm336_vm0, %v454_v45  ;;  %v774_v45 = vld [vmem:[%s277_s11] sm:$0xff] }
 0x276   : > { %1001 = vmatprep.mubr.msk.bf16.mxu1 %vm1221_vm1, %v1220_v10 }
 0x348   : > { %v541_v46 = vpop.f32.mrb[4].mxu1 }
 0x349   : > { %v543_v47 = vpop.f32.mrb[5].mxu1 }
 0x34a   : > { %v545_v48 = vpop.f32.mrb[6].mxu1 }
 0x34b   : > { %v1072_v49 = vpack.i.bf16 %v545_v48, %v541_v46  ;;  %v558_v50 = vpack.c.bf16 %v545_v48, %v541_v46  ;;  %v547_v51 = vpop.f32.mrb[7].mxu1  ;;  %v775_v46 = vld [vmem:[%s277_s11 + $0x8] sm:$0xff] }
 0x34c   : > { %v790_v48 = vsub.f32 1.0, %v775_v46 }
 0x34d   : > { %1073 = vrot.lane.b32.xlu0 %v1072_v49, %s1222_s13  ;;  %990 = vmatpush3.bf16.msra.mxu0 %v558_v50 }
 0x34e   : > { %991 = vmatprep.subr.bf16.mxu0 %v1220_v10 }
 0x3bf   : > { %v1074_v52 = vpop.permute.xlu0 %1073 }
 0x3c0   : > { %v1076_v53 = vunpack.i.h.bf16 %v1074_v52  ;;  %v1075_v54 = vunpack.i.l.bf16 %v1074_v52 }
 0x3c2   : > { %v559_v56 = vpack.c.bf16 %v1076_v53, %v1075_v54 }
 0x3c4   : > { %992 = vmatpush3.bf16.msra.mxu0 %v559_v56 }
 0x3c5   : > { %666 = vmatprep.subr.bf16.mxu0 %v1110_v55 }
 0x3c7   : > { %994 = vmatmul.mubr.msk.bf16.vlgmr.msra.gmra.mrb[4].mxu0 %vm399_vm2, %v1362_v22 }
 0x3c8   : > { %667 = vmatpush1.bf16.msra.mxu0 %v1108_v57  ;;  %698 = vmatprep.mubr.bf16.mxu0 %v1219_v0 }
 0x3c9   : > { %668 = vmatprep.subr.bf16.mxu0 %v1113_v58 }
 0x3cc   : > { %669 = vmatpush1.bf16.msra.mxu0 %v1111_v59 }
 0x3cd   : > { %670 = vmatprep.subr.bf16.mxu0 %v1116_v60 }
 0x3d0   : > { %671 = vmatpush1.bf16.msra.mxu0 %v1114_v61 }
 0x3d1   : > { %672 = vmatprep.subr.bf16.mxu0 %v1119_v62 }
 0x3d4   : > { %673 = vmatpush1.bf16.msra.mxu0 %v1117_v63 }
 0x49a   : > { %v596_v3 = vpop.f32.mrb[4].mxu0 }
 0x49b   : > { %v597_v4 = vadd.f32 %v596_v3, %v543_v47  ;;  %v995_v5 = vpop.f32.mrb[5].mxu0  ;;  %v789_v47 = vsub.f32 1.0, %v774_v45 }
 0x49c   : > { %v599_v0 = vpop.f32.mrb[6].mxu0 }
 0x49d   : > { %v609_v6 = vadd.f32 %v607_v2, %v597_v4  ;;  %v600_v7 = vadd.f32 %v599_v0, %v547_v51  ;;  %v996_v8 = vpop.f32.mrb[7].mxu0 }
 0x49f   : > { %v610_v9 = vadd.f32 %v607_v2, %v600_v7  ;;  %v611_v11 = vmax.f32 %v609_v6, 0.0 }
 0x4a1   : > { %v612_v12 = vmax.f32 %v610_v9, 0.0 }
 0x4a3   : > { %v613_v13 = vpack.c.bf16 %v612_v12, %v611_v11 }
 0x4a5   : > { %959 = vmatmul.mubr.msk.bf16.vlgmr.msra.gmra.mrb[8].mxu0 %vm336_vm0, %v613_v13 }
 0x578   : > { %v700_v14 = vpop.f32.mrb[8].mxu0 }
 0x579   : > { %v702_v15 = vpop.f32.mrb[9].mxu0 }
 0x57a   : > { %v703_v16 = vpop.f32.mrb[10].mxu0 }
 0x57b   : > { %v715_v17 = vpack.c.bf16 %v703_v16, %v700_v14  ;;  %721 = vrot.lane.b32.xlu0 %v703_v16, %s1223_s23  ;;  %v705_v18 = vpop.f32.mrb[11].mxu0  ;;  %v1077_v19 = vpack.i.bf16 %v703_v16, %v700_v14 }
 0x57d   : > { %1078 = vrot.lane.b32.xlu1 %v1077_v19, %s1224_s25  ;;  %998 = vmatpush3.bf16.msra.mxu1 %v715_v17  ;;  %s1407_s25 = scalar_lea.hbm %s1457_s5, %s971_s17 }
 0x57e   : > { %999 = vmatprep.subr.bf16.mxu1 %v1220_v10 }
 0x581   : > { %719 = vrot.lane.b32.xlu1 %v700_v14, %s1223_s23 }
 0x5ed   : > { %v722_v10 = vpop.permute.xlu0 %721 }
 0x5ef   : > { %v1079_v20 = vpop.permute.xlu1 %1078 }
 0x5f0   : > { %v1081_v21 = vunpack.i.h.bf16 %v1079_v20  ;;  %v1080_v23 = vunpack.i.l.bf16 %v1079_v20 }
 0x5f2   : > { %v716_v24 = vpack.c.bf16 %v1081_v21, %v1080_v23 }
 0x5f3   : > { %v720_v27 = vpop.permute.xlu1 %719 }
 0x5f4   : > { %1000 = vmatpush3.bf16.msra.mxu1 %v716_v24 }
 0x5f7   : > { %1002 = vmatmul.mubr.msk.bf16.vlgmr.msra.gmra.mrb[8].mxu1 %vm399_vm2, %v1362_v22 }
 0x6ca   : > { %v759_v28 = vpop.f32.mrb[8].mxu1 }
 0x6cb   : > { %v760_v29 = vadd.f32 %v759_v28, %v720_v27  ;;  %v1003_v30 = vpop.f32.mrb[9].mxu1 }
 0x6cc   : > { %v762_v31 = vpop.f32.mrb[10].mxu1 }
 0x6cd   : > { %v772_v33 = vadd.f32 %v770_v26, %v760_v29  ;;  %v763_v34 = vadd.f32 %v762_v31, %v722_v10  ;;  %v1004_v35 = vpop.f32.mrb[11].mxu1 }
 0x6cf   : > { %v773_v36 = vadd.f32 %v770_v26, %v763_v34  ;;  %v777_v22 = vsel %vm776_vm3, %v772_v33, inf  ;;  %v791_v50 = vmul.f32 %v789_v47, %v772_v33 }
 0x6d1   : > { %v778_v37 = vsel %vm776_vm3, %v773_v36, inf  ;;  %v792_v51 = vmul.f32 %v790_v48, %v773_v36 }
 0x6d2   : > { %v779_v38 = vmin.f32 %v777_v22, %v778_v37 }
 0x6d4   : > { %780 = vmin.xlane.f32.xlu1 %v779_v38 }
 0x761   : > { %v781_v32 = vpop.xlane.xlu1 %780 }
 0x762   : > { %v782_v39 = vrot.slane %v781_v32, 4 }
 0x764   : > { %v783_v40 = vmin.f32 %v781_v32, %v782_v39 }
 0x766   : > { %v784_v41 = vrot.slane %v783_v40, 2 }
 0x768   : > { %v785_v42 = vmin.f32 %v783_v40, %v784_v41 }
 0x76a   : > { %v786_v43 = vrot.slane %v785_v42, 1 }
 0x76c   : > { %v787_v44 = vmin.f32 %v785_v42, %v786_v43 }
 0x76e   : > { %1005 = vpush %v787_v44 }
 0x79f   : > { %s1006_s13 = spop %1005 }
 0x7a0   : > { %s962_s14 = sadd.f32 -1.0, %s1006_s13 }
 0x7a2   : > { %v794_v49 = vstv %s962_s14 }
 0x7a3   : > { %v795_v52 = vmul.f32 %v794_v49, %v774_v45  ;;  %v796_v53 = vmul.f32 %v794_v49, %v775_v46 }
 0x7a5   : > { %v797_v54 = vadd.f32 %v795_v52, %v791_v50  ;;  %v798_v55 = vadd.f32 %v796_v53, %v792_v51 }
 0x7a7   : > { %v799_v56 = vsel %vm776_vm3, %v797_v54, 0.0  ;;  %v800_v57 = vsel %vm776_vm3, %v798_v55, 0.0 }
 0x7a8   : > { %801 = vst [vmem:[%s262_s15] sm:$0xff] %v799_v56  ;;  %802 = vst [vmem:[%s262_s15 + $0x8] sm:$0xff] %v800_v57 }
 0x7a9   : > { %1161 = shalt.err (!%p1158_p7)
}
 0x7aa   : > { %s1162_s8 = scalar_lea.hbm %s1407_s25, 256  ;;  %s1166_s12 = scalar_lea.hbm %s1457_s5, 512 }
 0x7ab   : > { %p1163_p8 = scmp.ne.s32.totalorder %s1407_s25, %s1162_s8  ;;  %p1167_p1 = scmp.lt.u32.totalorder %s1407_s25, %s1457_s5 }
 0x7ac   : > { %p1168_p0 = scmp.lt.u32.totalorder %s1166_s12, %s1162_s8  ;;  %p1170_p6 = scmp.lt.u32.totalorder %s1162_s8, %s1407_s25 }
 0x7ad   : > { %p1164_p11 = pnand %p1163_p8, %p1468_p9 }
 0x7ae   : > { %p1169_p5 = por %p1168_p0, %p1167_p1 }
 0x7af   : > { %p1165_p13 = pneg %p1164_p11 }
 0x7b0   : > { %p1171_p10 = por %p1170_p6, %p1169_p5 }
 0x7b2   : > { %p1172_p12 = pnand %p1171_p10, %p1165_p13 }
 0x7b4   : > { %1175 = shalt.err (!%p1172_p12)
}
 0x7b5   : > { %s1226_s15 = smov 128   ;;  %s1227_s17 = smov 8  }
 0x7b6   : > { %1011 = dma.vmem_to_hbm [thread:$0]  (%p1468_p9), %s1402_s16, 256, %s1407_s25, %s1411_s22, %s1226_s15, %s1226_s15, %s1227_s17  }
 0x7b7 PF: > { %p1023_p2 = scmp.ge.s32.totalorder %s1214_s21, 2  ;;  %s832_s6 = sand.u32 1, %s1202_s18  }
 0x7b8   : > { %p1469_p3 = scmp.ne.s32.totalorder %s1462_s29, 0  ;;  %s833_s23 = scalar_lea.sflag [#allocation4], %s832_s6 }
 0x7ba   : > { %p1018_p4 = pnand %p1023_p2, %p1469_p3 }
 0x7bc   : > { %1197 = dma.done.wait (!%p1018_p4), %s833_s23, 256  }
 0x7bd   : > { %1199 = vsyncadd (!%p1018_p4), %s833_s23, 4294967040  ;;  %p16_p7 = scmp.ge.s32.totalorder %s1283_s24, 4   ;;  %s1470_s18 = smov %s1206_s19 }
 0x7be   : > { %s1471_s19 = smov %s1210_s20  ;;  %s1472_s20 = smov %s1294_s27 }
 0x7bf   : > { %s1473_s21 = smov %s1283_s24  ;;  %18 = sbr.rel (!%p16_p7) target bundleno = 4 (0x4), region = 90 }
 0x7c6   :  { %838 = vsyncpa [#allocation3], 1 }
 0x7c7   :  { %840 = vsyncpa [#allocation3 + $0x1], 1 }
 0x7c8   :  { %841 = vsyncpa [#allocation4], 1 }
 0x7c9   :  { %843 = vsyncpa [#allocation4 + $0x1], 1 }

</bundles_post_ra>
